<compile_context>
chip_gen: v6e
topology: v6e:2x2x1
jax: 0.10.0
libtpu: 0.0.40
codegen_flags: <defaults>
</compile_context>

<pallas_src>
import numpy as np
import jax
import jax.numpy as jnp
from jax.experimental import pallas as pl
from jax.experimental.pallas import tpu as pltpu

_SMEM_SPACE = pltpu.MemorySpace.SMEM if hasattr(pltpu, "MemorySpace") else pltpu.SMEM


def _tpu_generation():
    """Best-effort TPU generation from device_kind (5 / 6 / 7)."""
    try:
        kind = jax.devices()[0].device_kind.lower()
    except Exception:
        return 6
    if "v7" in kind or "7x" in kind:
        return 7
    if "v6" in kind:
        return 6
    if "v5" in kind or "v4" in kind or "v3" in kind or "v2" in kind:
        return 5          # f32 elementwise path, conservative
    return 6


# ----------------------------- Pallas kernel --------------------------------
def _make_asff2_kernel(cout, compute_dtype, bf16_eltwise):
    """Fused ASFF2 forward for one (C, TS) channel-major tile of pixels."""
    f32 = jnp.float32

    def kernel(f1_ref, f2_ref, w1_ref, w2_ref, we_ref, vp_ref, dba_ref, out_ref):
        f1 = f1_ref[...]                                   # (C, TS) input dtype
        f2 = f2_ref[...]
        f1c = f1.astype(compute_dtype)                     # matmul operand dtype
        f2c = f2.astype(compute_dtype)

        # packed per-channel vectors: cols = [da, b_bn, b_e]
        da1 = vp_ref[0:cout, 0:1]                          # (Cout, 1) f32
        da2 = vp_ref[cout:2 * cout, 0:1]
        b1 = vp_ref[0:cout, 1:2]
        b2 = vp_ref[cout:2 * cout, 1:2]
        be = vp_ref[0:cout, 2:3]
        dba = dba_ref[0]                                   # SMEM scalar f32

        # weight1 / weight2 branches: folded-BN 1x1 conv + bias + ReLU  (Cout, TS)
        w1 = jnp.maximum(
            jnp.dot(w1_ref[...], f1c, preferred_element_type=f32) + b1, 0.0)
        w2 = jnp.maximum(
            jnp.dot(w2_ref[...], f2c, preferred_element_type=f32) + b2, 0.0)

        # softmax over the 2 level-logits == sigmoid(l0 - l1)   (exact identity)
        d = jnp.sum(w1 * da1 + w2 * da2, axis=0, keepdims=True) + dba   # (1, TS)
        e = jnp.exp(-jnp.abs(d))
        r = 1.0 / (1.0 + e)
        p0 = jnp.where(d >= 0, r, e * r)                   # numerically stable
        p1 = 1.0 - p0

        # weighted fusion of the two input feature maps
        if bf16_eltwise:                                   # v6e / v7x: bf16 VALU
            fused = f1c * p0.astype(compute_dtype) + f2c * p1.astype(compute_dtype)
        else:                                              # v5e / f32 path
            fused = (f1.astype(f32) * p0 + f2.astype(f32) * p1).astype(compute_dtype)

        # expand_conv: folded-BN 1x1 conv + bias + ReLU
        out = jnp.dot(we_ref[...], fused, preferred_element_type=f32) + be
        out_ref[...] = jnp.maximum(out, 0.0).astype(out_ref.dtype)

    return kernel


# ------------------------------- wrapper -------------------------------------
def asff2_forward(f1_nchw, f2_nchw, params, *, ts_target=None,
                  compute_dtype=jnp.bfloat16, out_dtype=None):
    """f1, f2: (N, C, H, W) NCHW.  Returns (N, Cout, H, W) in out_dtype
    (defaults to compute_dtype).  Cout must equal C (required by the module)."""
    N, C, H, W = f1_nchw.shape
    assert f2_nchw.shape == f1_nchw.shape
    cout = params["W_e"].shape[0]
    assert C == cout, "ASFF2 forward requires out_channels == in_channels"
    S = H * W
    gen = _tpu_generation()
    if out_dtype is None:
        out_dtype = compute_dtype
    bf16_eltwise = (np.dtype(compute_dtype) == np.dtype(jnp.bfloat16)) and gen >= 6

    # (N,C,H,W) -> (N,C,S): contiguous collapse, no data movement / HBM pass.
    f1 = f1_nchw.reshape(N, C, S)
    f2 = f2_nchw.reshape(N, C, S)

    # Fold the BN per-channel scale into the (Cout, C) conv weights (row scale).
    w1f = (params["W_1"] * params["s_1"][:, None]).astype(compute_dtype)
    w2f = (params["W_2"] * params["s_2"][:, None]).astype(compute_dtype)
    wef = (params["W_e"] * params["s_e"][:, None]).astype(compute_dtype)

    # Pack per-channel vectors into one (2*Cout, 3) f32 array:
    #   col0 = W_a[0]-W_a[1] (gate weight diff), col1 = [b_1; b_2], col2 = [b_e; 0]
    da12 = params["W_a"][0] - params["W_a"][1]                       # (2*Cout,)
    b12 = jnp.concatenate([params["b_1"], params["b_2"]])            # (2*Cout,)
    be_pad = jnp.concatenate([params["b_e"], jnp.zeros_like(params["b_e"])])
    vparams = jnp.stack([da12, b12, be_pad], axis=1).astype(jnp.float32)
    dba = jnp.reshape(params["b_a"][0] - params["b_a"][1], (1,)).astype(jnp.float32)

    # ---- spatial tile (lane axis) selection -------------------------------
    if ts_target is None:
        ts_target = 2048 if C <= 256 else (1024 if C <= 512 else 512)
    ts_target = int(ts_target)
    if S % 128 == 0:
        ts = max(128, (min(ts_target, S) // 128) * 128)
    elif S <= ts_target:
        ts = S                                      # full-extent lane block
    else:
        ts = max(128, (ts_target // 128) * 128)     # ragged tail: masked stores

    act_b = np.dtype(compute_dtype).itemsize
    in_b = np.dtype(f1_nchw.dtype).itemsize
    out_b = np.dtype(out_dtype).itemsize

    def tile_vmem_bytes(ts_):
        io = 2 * (2 * C * ts_ * in_b) + 2 * (cout * ts_ * out_b)   # 2x-buffered I/O
        wts = 2 * (3 * C * cout * act_b + vparams.size * 4)
        live = (2 * C + 3 * cout + 8) * ts_ * 4                    # f32 intermediates
        return io + wts + live

    try:
        vmem_phys = int(pltpu.get_tpu_info().vmem_capacity_bytes)
    except Exception:
        vmem_phys = (64 if gen >= 7 else 128) * 2 ** 20
    vmem_budget = (vmem_phys * 3) // 4              # headroom (v7x: ~48 of 64 MiB)
    while ts > 128 and ts % 256 == 0 and tile_vmem_bytes(ts) > vmem_budget // 2:
        ts //= 2

    grid_s = pl.cdiv(S, ts)
    # keep >= 2 programs so both of v7x's TensorCores get work
    while N * grid_s < 2 and ts > 128 and ts % 256 == 0:
        ts //= 2
        grid_s = pl.cdiv(S, ts)

    vmem_limit = int(min(vmem_budget, max(16 * 2 ** 20, 2 * tile_vmem_bytes(ts))))

    # ---- specs / cost ------------------------------------------------------
    row_spec = pl.BlockSpec((None, C, ts), lambda n, s: (n, 0, s))
    out_spec = pl.BlockSpec((None, cout, ts), lambda n, s: (n, 0, s))

    def full_spec(shape):
        return pl.BlockSpec(shape, lambda n, s: (0, 0))

    in_specs = [
        row_spec,                                   # f1  (N, C, S)
        row_spec,                                   # f2
        full_spec(w1f.shape),                       # W1 folded  (grid-invariant)
        full_spec(w2f.shape),                       # W2 folded
        full_spec(wef.shape),                       # We folded
        full_spec(vparams.shape),                   # packed channel vectors
        pl.BlockSpec(memory_space=_SMEM_SPACE),     # dba scalar in SMEM
    ]

    pix = N * S
    cost = pl.CostEstimate(
        flops=int(2 * pix * C * cout * 3 + 12 * pix * C),
        transcendentals=int(pix),
        bytes_accessed=int(pix * (2 * C * in_b + cout * out_b)
                           + 3 * C * cout * act_b + vparams.size * 4 + 4))

    kernel = _make_asff2_kernel(cout, compute_dtype, bf16_eltwise)
    out3 = pl.pallas_call(
        kernel,
        out_shape=jax.ShapeDtypeStruct((N, cout, S), out_dtype),
        grid_spec=pltpu.PrefetchScalarGridSpec(
            num_scalar_prefetch=0,
            grid=(N, grid_s),
            in_specs=in_specs,
            out_specs=out_spec,
        ),
        compiler_params=pltpu.CompilerParams(
            dimension_semantics=("parallel", "parallel"),
            vmem_limit_bytes=vmem_limit),
        cost_estimate=cost,
    )(f1, f2, w1f, w2f, wef, vparams, dba)

    return out3.reshape(N, cout, H, W)


# --------------------------- parameter construction --------------------------
def fold_bn(gamma, beta, mean, var, eps=1e-5):
    """Per-channel (scale, bias) so that BN(x) == x*scale + bias."""
    scale = gamma / jnp.sqrt(var + eps)
    bias = beta - mean * scale
    return scale, bias                               # each (C,)


def make_params(key, cin, cout):
    ks = jax.random.split(key, 8)

    def conv_w(k, co, ci):
        # PyTorch Conv2d 1x1 weight (co, ci, 1, 1) squeezed to (co, ci)
        return jax.random.normal(k, (co, ci), jnp.float32) * 0.1

    def bn(k, c):
        k1, k2, k3, k4 = jax.random.split(k, 4)
        gamma = 1.0 + 0.1 * jax.random.normal(k1, (c,), jnp.float32)
        beta = 0.1 * jax.random.normal(k2, (c,), jnp.float32)
        mean = 0.1 * jax.random.normal(k3, (c,), jnp.float32)
        var = jnp.abs(jax.random.normal(k4, (c,), jnp.float32)) + 0.5
        return fold_bn(gamma, beta, mean, var)

    W_1 = conv_w(ks[0], cout, cin); s_1, b_1 = bn(ks[1], cout)
    W_2 = conv_w(ks[2], cout, cin); s_2, b_2 = bn(ks[3], cout)
    W_a = conv_w(ks[4], 2, 2 * cin)                  # weight_All: Conv(2*cin -> 2)
    b_a = 0.1 * jax.random.normal(ks[5], (2,), jnp.float32)
    W_e = conv_w(ks[6], cout, cin); s_e, b_e = bn(ks[7], cout)

    return dict(W_1=W_1, s_1=s_1, b_1=b_1, W_2=W_2, s_2=s_2, b_2=b_2,
                W_a=W_a, b_a=b_a, W_e=W_e, s_e=s_e, b_e=b_e)


# ------------------------------ pure-JAX reference ---------------------------
def asff2_reference(f1, f2, p):
    def cbr(x, Wm, s, b):
        y = jnp.einsum('oc,nchw->nohw', Wm, x)
        return jnp.maximum(y * s[None, :, None, None] + b[None, :, None, None], 0.0)

    w1 = cbr(f1, p["W_1"], p["s_1"], p["b_1"])
    w2 = cbr(f2, p["W_2"], p["s_2"], p["b_2"])
    cat = jnp.concatenate([w1, w2], axis=1)
    logits = jnp.einsum('oc,nchw->nohw', p["W_a"], cat) + p["b_a"][None, :, None, None]
    probs = jax.nn.softmax(logits, axis=1)
    fused = f1 * probs[:, 0:1] + f2 * probs[:, 1:2]
    return cbr(fused, p["W_e"], p["s_e"], p["b_e"])


# ----------------------------------- main ------------------------------------
if __name__ == "__main__":
    key = jax.random.PRNGKey(0)
    k_f1, k_f2, k_p = jax.random.split(key, 3)

    N, C, H, W = 2, 4, 16, 16                      # in_channels == out_channels == 4
    f1 = jax.random.normal(k_f1, (N, C, H, W), jnp.float32)
    f2 = jax.random.normal(k_f2, (N, C, H, W), jnp.float32)
    params = make_params(k_p, C, C)

    ref = asff2_reference(f1, f2, params)

    # exact-math check: f32 compute + f32 output, small spatial tile so the
    # grid has multiple steps along the spatial axis.
    out_f32 = jax.block_until_ready(
        asff2_forward(f1, f2, params, compute_dtype=jnp.float32,
                      out_dtype=jnp.float32, ts_target=128))
    assert out_f32.shape == (N, C, H, W)
    assert jnp.allclose(out_f32, ref, atol=1e-4, rtol=1e-4), "f32 mismatch"

    # default fast path: bf16 matmul streams, bf16 elementwise (v6e/v7x),
    # bf16 output (looser tolerance).
    out_fast = jax.block_until_ready(asff2_forward(f1, f2, params))
    assert out_fast.shape == (N, C, H, W)
    assert jnp.allclose(out_fast.astype(jnp.float32), ref,
                        atol=5e-2, rtol=5e-2), "bf16 mismatch"

    print("KERNEL_OK")
</pallas_src>

<mosaic_0001>
module attributes {stable_mosaic.version = 11 : i64} {
  func.func @kernel(%arg0: i32, %arg1: i32, %arg2: memref<1x4x128xf32, #tpu.memory_space<vmem>>, %arg3: memref<1x4x128xf32, #tpu.memory_space<vmem>>, %arg4: memref<4x4xf32, #tpu.memory_space<vmem>>, %arg5: memref<4x4xf32, #tpu.memory_space<vmem>>, %arg6: memref<4x4xf32, #tpu.memory_space<vmem>>, %arg7: memref<8x3xf32, #tpu.memory_space<vmem>>, %arg8: memref<1xf32, #tpu.memory_space<smem>>, %arg9: memref<1x4x128xf32, #tpu.memory_space<vmem>>) attributes {dimension_semantics = [#tpu.dimension_semantics<parallel>, #tpu.dimension_semantics<parallel>], iteration_bounds = array<i64: 2, 2>, scalar_prefetch = 0 : i64, scratch_operands = 0 : i64, tpu.core_type = #tpu.core_type<tc>, window_params = [{transform_indices = @transform_0, window_bounds = array<i64: 1, 4, 128>}, {transform_indices = @transform_1, window_bounds = array<i64: 1, 4, 128>}, {pipeline_mode = #tpu.pipeline_mode<synchronous>, transform_indices = @transform_2, window_bounds = array<i64: 4, 4>}, {pipeline_mode = #tpu.pipeline_mode<synchronous>, transform_indices = @transform_3, window_bounds = array<i64: 4, 4>}, {pipeline_mode = #tpu.pipeline_mode<synchronous>, transform_indices = @transform_4, window_bounds = array<i64: 4, 4>}, {pipeline_mode = #tpu.pipeline_mode<synchronous>, transform_indices = @transform_5, window_bounds = array<i64: 8, 3>}, {transform_indices = @transform_6, window_bounds = array<i64: 1>}, {transform_indices = @transform_7, window_bounds = array<i64: 1, 4, 128>}]} {
    %c0 = arith.constant 0 : index
    %c0_0 = arith.constant 0 : index
    %c0_1 = arith.constant 0 : index
    %0 = vector.load %arg2[%c0, %c0_0, %c0_1] : memref<1x4x128xf32, #tpu.memory_space<vmem>>, vector<1x4x128xf32>
    %1 = vector.shape_cast %0 : vector<1x4x128xf32> to vector<4x128xf32>
    %c0_2 = arith.constant 0 : index
    %c0_3 = arith.constant 0 : index
    %c0_4 = arith.constant 0 : index
    %2 = vector.load %arg3[%c0_2, %c0_3, %c0_4] : memref<1x4x128xf32, #tpu.memory_space<vmem>>, vector<1x4x128xf32>
    %3 = vector.shape_cast %2 : vector<1x4x128xf32> to vector<4x128xf32>
    %c0_5 = arith.constant 0 : index
    %c0_6 = arith.constant 0 : index
    %4 = vector.load %arg7[%c0_5, %c0_6] : memref<8x3xf32, #tpu.memory_space<vmem>>, vector<4x1xf32>
    %c4 = arith.constant 4 : index
    %c0_7 = arith.constant 0 : index
    %5 = vector.load %arg7[%c4, %c0_7] : memref<8x3xf32, #tpu.memory_space<vmem>>, vector<4x1xf32>
    %c0_8 = arith.constant 0 : index
    %c1 = arith.constant 1 : index
    %6 = vector.load %arg7[%c0_8, %c1] : memref<8x3xf32, #tpu.memory_space<vmem>>, vector<4x1xf32>
    %c4_9 = arith.constant 4 : index
    %c1_10 = arith.constant 1 : index
    %7 = vector.load %arg7[%c4_9, %c1_10] : memref<8x3xf32, #tpu.memory_space<vmem>>, vector<4x1xf32>
    %c0_11 = arith.constant 0 : index
    %c2 = arith.constant 2 : index
    %8 = vector.load %arg7[%c0_11, %c2] : memref<8x3xf32, #tpu.memory_space<vmem>>, vector<4x1xf32>
    %c0_12 = arith.constant 0 : index
    %9 = memref.load %arg8[%c0_12] : memref<1xf32, #tpu.memory_space<smem>>
    %c0_13 = arith.constant 0 : index
    %c0_14 = arith.constant 0 : index
    %10 = vector.load %arg4[%c0_13, %c0_14] : memref<4x4xf32, #tpu.memory_space<vmem>>, vector<4x4xf32>
    %cst = arith.constant dense<0.000000e+00> : vector<4x128xf32>
    %11 = tpu.matmul %10, %1, %cst {dimension_numbers = #tpu.dot_dimension_numbers<[1], [0], [0], [1], [0, 0, 1, 1], [], []>} : vector<4x4xf32>, vector<4x128xf32>, vector<4x128xf32> -> vector<4x128xf32>
    %12 = vector.broadcast %6 : vector<4x1xf32> to vector<4x128xf32>
    %13 = arith.addf %11, %12 : vector<4x128xf32>
    %cst_15 = arith.constant 0.000000e+00 : f32
    %14 = vector.broadcast %cst_15 : f32 to vector<4x128xf32>
    %15 = arith.maximumf %13, %14 : vector<4x128xf32>
    %c0_16 = arith.constant 0 : index
    %c0_17 = arith.constant 0 : index
    %16 = vector.load %arg5[%c0_16, %c0_17] : memref<4x4xf32, #tpu.memory_space<vmem>>, vector<4x4xf32>
    %cst_18 = arith.constant dense<0.000000e+00> : vector<4x128xf32>
    %17 = tpu.matmul %16, %3, %cst_18 {dimension_numbers = #tpu.dot_dimension_numbers<[1], [0], [0], [1], [0, 0, 1, 1], [], []>} : vector<4x4xf32>, vector<4x128xf32>, vector<4x128xf32> -> vector<4x128xf32>
    %18 = vector.broadcast %7 : vector<4x1xf32> to vector<4x128xf32>
    %19 = arith.addf %17, %18 : vector<4x128xf32>
    %cst_19 = arith.constant 0.000000e+00 : f32
    %20 = vector.broadcast %cst_19 : f32 to vector<4x128xf32>
    %21 = arith.maximumf %19, %20 : vector<4x128xf32>
    %22 = vector.broadcast %4 : vector<4x1xf32> to vector<4x128xf32>
    %23 = arith.mulf %15, %22 : vector<4x128xf32>
    %24 = vector.broadcast %5 : vector<4x1xf32> to vector<4x128xf32>
    %25 = arith.mulf %21, %24 : vector<4x128xf32>
    %26 = arith.addf %23, %25 : vector<4x128xf32>
    %cst_20 = arith.constant dense<0.000000e+00> : vector<128xf32>
    %27 = vector.multi_reduction <add>, %26, %cst_20 [0] : vector<4x128xf32> to vector<128xf32>
    %28 = vector.shape_cast %27 : vector<128xf32> to vector<1x128xf32>
    %29 = vector.broadcast %9 : f32 to vector<1x128xf32>
    %30 = arith.addf %28, %29 : vector<1x128xf32>
    %31 = math.absf %30 : vector<1x128xf32>
    %cst_21 = arith.constant 0.000000e+00 : f32
    %32 = vector.broadcast %cst_21 : f32 to vector<1x128xf32>
    %33 = arith.subf %32, %31 : vector<1x128xf32>
    %34 = math.exp %33 : vector<1x128xf32>
    %cst_22 = arith.constant 1.000000e+00 : f32
    %35 = vector.broadcast %cst_22 : f32 to vector<1x128xf32>
    %36 = arith.addf %35, %34 : vector<1x128xf32>
    %cst_23 = arith.constant 1.000000e+00 : f32
    %37 = vector.broadcast %cst_23 : f32 to vector<1x128xf32>
    %38 = arith.divf %37, %36 : vector<1x128xf32>
    %cst_24 = arith.constant 0.000000e+00 : f32
    %39 = vector.broadcast %cst_24 : f32 to vector<1x128xf32>
    %40 = arith.cmpf oge, %30, %39 : vector<1x128xf32>
    %41 = arith.mulf %34, %38 : vector<1x128xf32>
    %42 = arith.select %40, %38, %41 : vector<1x128xi1>, vector<1x128xf32>
    %cst_25 = arith.constant 1.000000e+00 : f32
    %43 = vector.broadcast %cst_25 : f32 to vector<1x128xf32>
    %44 = arith.subf %43, %42 : vector<1x128xf32>
    %45 = vector.broadcast %42 : vector<1x128xf32> to vector<4x128xf32>
    %46 = arith.mulf %1, %45 : vector<4x128xf32>
    %47 = vector.broadcast %44 : vector<1x128xf32> to vector<4x128xf32>
    %48 = arith.mulf %3, %47 : vector<4x128xf32>
    %49 = arith.addf %46, %48 : vector<4x128xf32>
    %c0_26 = arith.constant 0 : index
    %c0_27 = arith.constant 0 : index
    %50 = vector.load %arg6[%c0_26, %c0_27] : memref<4x4xf32, #tpu.memory_space<vmem>>, vector<4x4xf32>
    %cst_28 = arith.constant dense<0.000000e+00> : vector<4x128xf32>
    %51 = tpu.matmul %50, %49, %cst_28 {dimension_numbers = #tpu.dot_dimension_numbers<[1], [0], [0], [1], [0, 0, 1, 1], [], []>} : vector<4x4xf32>, vector<4x128xf32>, vector<4x128xf32> -> vector<4x128xf32>
    %52 = vector.broadcast %8 : vector<4x1xf32> to vector<4x128xf32>
    %53 = arith.addf %51, %52 : vector<4x128xf32>
    %cst_29 = arith.constant 0.000000e+00 : f32
    %54 = vector.broadcast %cst_29 : f32 to vector<4x128xf32>
    %55 = arith.maximumf %53, %54 : vector<4x128xf32>
    %c0_30 = arith.constant 0 : index
    %c0_31 = arith.constant 0 : index
    %c0_32 = arith.constant 0 : index
    %56 = vector.load %arg9[%c0_30, %c0_31, %c0_32] : memref<1x4x128xf32, #tpu.memory_space<vmem>>, vector<1x4x128xf32>
    %57 = vector.shape_cast %56 : vector<1x4x128xf32> to vector<4x128xf32>
    %58 = vector.shape_cast %55 : vector<4x128xf32> to vector<1x4x128xf32>
    tpu.vector_store %arg9[%c0_30, %c0_31, %c0_32], %58 {strides = array<i32>} : memref<1x4x128xf32, #tpu.memory_space<vmem>>, vector<1x4x128xf32>,
    return
  }
  func.func @transform_0(%arg0: i32, %arg1: i32) -> (i32, i32, i32) {
    %c0_i32 = arith.constant 0 : i32
    %c0_i32_0 = arith.constant 0 : i32
    return %arg0, %c0_i32, %arg1 : i32, i32, i32
  }
  func.func @transform_1(%arg0: i32, %arg1: i32) -> (i32, i32, i32) {
    %c0_i32 = arith.constant 0 : i32
    %c0_i32_0 = arith.constant 0 : i32
    return %arg0, %c0_i32, %arg1 : i32, i32, i32
  }
  func.func @transform_2(%arg0: i32, %arg1: i32) -> (i32, i32) {
    %c0_i32 = arith.constant 0 : i32
    %c0_i32_0 = arith.constant 0 : i32
    %c0_i32_1 = arith.constant 0 : i32
    return %c0_i32, %c0_i32_0 : i32, i32
  }
  func.func @transform_3(%arg0: i32, %arg1: i32) -> (i32, i32) {
    %c0_i32 = arith.constant 0 : i32
    %c0_i32_0 = arith.constant 0 : i32
    %c0_i32_1 = arith.constant 0 : i32
    return %c0_i32, %c0_i32_0 : i32, i32
  }
  func.func @transform_4(%arg0: i32, %arg1: i32) -> (i32, i32) {
    %c0_i32 = arith.constant 0 : i32
    %c0_i32_0 = arith.constant 0 : i32
    %c0_i32_1 = arith.constant 0 : i32
    return %c0_i32, %c0_i32_0 : i32, i32
  }
  func.func @transform_5(%arg0: i32, %arg1: i32) -> (i32, i32) {
    %c0_i32 = arith.constant 0 : i32
    %c0_i32_0 = arith.constant 0 : i32
    %c0_i32_1 = arith.constant 0 : i32
    return %c0_i32, %c0_i32_0 : i32, i32
  }
  func.func @transform_6(%arg0: i32, %arg1: i32) -> i32 {
    %c0_i32 = arith.constant 0 : i32
    %c0_i32_0 = arith.constant 0 : i32
    return %c0_i32 : i32
  }
  func.func @transform_7(%arg0: i32, %arg1: i32) -> (i32, i32, i32) {
    %c0_i32 = arith.constant 0 : i32
    %c0_i32_0 = arith.constant 0 : i32
    return %arg0, %c0_i32, %arg1 : i32, i32, i32
  }
}

</mosaic_0001>

<bundles_post_ra>
// kernel: tpu_custom_call.1
= control target key start
LH: loop header
LB: loop body
LE: loop exit
PB: predicated region body
PF: predicated region fallthrough
CT: control target
= control target key end

     0   :  { %s1337_s0 = inlined_call_operand.hbm [shape: f32[2,4,256], index: 0, kind: input, shape index: {}]   ;;  %s1338_s1 = inlined_call_operand.hbm [shape: f32[2,4,256], index: 1, kind: input, shape index: {}]   ;;  %s1339_s2 = inlined_call_operand.vmem [shape: f32[4,4], index: 2, kind: input, shape index: {}]   ;;  %s1340_s3 = inlined_call_operand.vmem [shape: f32[4,4], index: 3, kind: input, shape index: {}]   ;;  %s1341_s4 = inlined_call_operand.vmem [shape: f32[4,4], index: 4, kind: input, shape index: {}]   ;;  %s1342_s5 = inlined_call_operand.vmem [shape: f32[8,3], index: 5, kind: input, shape index: {}]   ;;  %s1343_s6 = inlined_call_operand.<no memory space> [shape: f32[1], index: 6, kind: input, shape index: {}]   ;;  %s1344_s7 = inlined_call_operand.hbm [shape: f32[2,4,256], index: 7, kind: output, shape index: {}]  }
   0x1   :  { %1349 = sst [smem:[#allocation16_spill]] %s1337_s0 }
   0x2   :  { %12 = sst [smem:[#allocation2]] %s1343_s6 }
   0x3   :  { %13 = vsyncpa [#allocation4], 0 }
   0x4   :  { %15 = vsyncpa [#allocation4 + $0x1], 0 }
   0x5   :  { %16 = vsyncpa [#allocation7], 0 }
   0x6   :  { %18 = vsyncpa [#allocation7 + $0x1], 0 }
   0x7   :  { %19 = vsyncpa [#allocation5], 0 }
   0x8   :  { %21 = vsyncpa [#allocation5 + $0x1], 0  ;;  %s1120_s26 = smov 0   ;;  %s1122_s27 = smov 0  }
   0x9   :  { %s1124_s28 = smov 0   ;;  %s1126_s29 = smov 0  }
   0xa   :  { %s1128_s30 = smov 0   ;;  %s1130_s8 = smov 0  }
   0xb   :  { %s1132_s9 = smov 0   ;;  %s1134_s6 = smov 0  }
   0xc LB: > { %1350 = sst [smem:[#allocation12_spill]] %s1063_s9  ;;  %s770_s10 = sadd.s32 4294967295, %s1067_s6   ;;  %s1067_s6 = sphi %s1134_s6, %s27_s6   ;;  %s1063_s9 = sphi %s1132_s9, %s1364_s9   ;;  %s1059_s8 = sphi %s1130_s8, %s1369_s8   ;;  %s1055_s30 = sphi %s1128_s30, %s1362_s30   ;;  %s1051_s29 = sphi %s1126_s29, %s1368_s29   ;;  %s1047_s28 = sphi %s1124_s28, %s1367_s28   ;;  %s1043_s27 = sphi %s1122_s27, %s1366_s27   ;;  %s1039_s26 = sphi %s1120_s26, %s1365_s26  }
   0xd   : > { %s771_s11 = sadd.s32 4294967294, %s1067_s6   ;;  %s36_s12 = sadd.s32 1, %s1059_s8 }
   0xe   : > { %s39_s13 = sadd.s32 1, %s1063_s9  ;;  %p37_p0 = scmp.ge.s32.totalorder %s36_s12, 2 }
   0xf   : > { %s48_s14 = sadd.s32 1, %s1047_s28  ;;  %p55_p1 = scmp.ne.s32.totalorder %s1047_s28, %s1043_s27 }
  0x10   : > { %p56_p2 = scmp.eq.s32.totalorder %s1067_s6, 0  ;;  %s1371_s12 = smov (%p37_p0, %s36_s12), 0 }
  0x11   : > { %1351 = sst [smem:[#allocation13_spill]] %s1371_s12  ;;  %s1373_s13 = smov (!%p37_p0, %s39_s13), %s1063_s9 }
  0x12   : > { %s44_s15 = ssub.s32 %s1059_s8, %s1371_s12  ;;  %p1173_p3 = por %p56_p2, %p55_p1 }
  0x13   : > { %p41_p4 = scmp.ge.s32.totalorder %s1373_s13, 2  ;;  %p61_p5 = scmp.ne.s32.totalorder %s1043_s27, %s1039_s26 }
  0x14   : > { %p62_p6 = scmp.eq.s32.totalorder %s770_s10, 0  ;;  %p220_p7 = scmp.eq.s32.totalorder %s770_s10, 3 }
  0x15   : > { %s1375_s13 = smov (%p41_p4, %s1373_s13), 0  ;;  %p226_p10 = scmp.eq.s32.totalorder %s771_s11, 3 }
  0x16   : > { %1353 = sst [smem:[#allocation14_spill]] %s1375_s13  ;;  %p1181_p8 = por %p62_p6, %p61_p5 }
  0x17   : > { %p1185_p9 = por %p220_p7, %p55_p1  ;;  %s43_s19 = ssub.s32 %s1063_s9, %s1375_s13 }
  0x18   : > { %s45_s20 = sor.u32 %s44_s15, %s43_s19  ;;  %p1191_p12 = por %p226_p10, %p61_p5 }
  0x19   : > { %p46_p11 = scmp.eq.s32.totalorder %s45_s20, 0  ;;  %p833_p13 = scmp.lt.s32.totalorder %s1067_s6, 4 }
  0x1a   : > { %s1356_s21 = scalar_select %p1191_p12, 1, 0 }
  0x1b   : > { %s1197_s22 = sand.u32 1, %s1047_s28   ;;  %s775_s25 = sshll.u32 %s1063_s9, 1 }
  0x1c   : > { %1357 = sst [smem:[#allocation15_spill]] %s1356_s21  ;;  %s774_s24 = sshll.u32 %s1197_s22, 2 }
  0x1d   : > { %s1200_s23 = scalar_select %p46_p11, %s1047_s28, %s48_s14  }
  0x1e   : > { %s270_s10 = sadd.s32 %s1059_s8, %s775_s25  ;;  %s265_s11 = scalar_lea.vmem [#allocation3], %s774_s24 }
  0x1f   : > { %s274_s15 = sshll.u32 %s265_s11, 4  ;;  %s776_s19 = sshll.u32 %s270_s10, 6  ;;  %s275_s15 = int_to_ptr.vmem [resolvable:$true] %s274_s15 }
  0x20   : > { %s1358_s0 = sld [smem:[#allocation16_spill]]  ;;  %p1212_p0 = pnand %p833_p13, %p1173_p3 }
  0x21   : > { %p780_p1 = scmp.ge.s32.totalorder %s1067_s6, 1  ;;  %p299_p2 = scmp.lt.s32.totalorder %s1067_s6, 5 }
  0x22   : > { %s262_s14 = scalar_lea.sflag [#allocation4], %s1197_s22  ;;  %p913_p4 = pneg %p1212_p0 }
  0x23   : > { %s924_s25 = scalar_lea.vmem %s275_s15, 64  ;;  %s1069_s13 = smov [#allocation3]  }
  0x24   : > { %p925_p5 = scmp.ne.s32.totalorder %s275_s15, %s924_s25  ;;  %s929_s10 = sshll.u32 %s1069_s13, 4  ;;  %s930_s10 = int_to_ptr.vmem [resolvable:$false] %s929_s10 }
  0x25   : > { %s931_s16 = scalar_lea.vmem %s930_s10, 128  ;;  %p932_p3 = scmp.lt.s32.totalorder %s275_s15, %s930_s10 }
  0x26   : > { %s272_s12 = scalar_lea.hbm %s1358_s0, %s776_s19  ;;  %p927_p6 = pnand %p925_p5, %p913_p4 }
  0x27   : > { %p933_p10 = scmp.lt.s32.totalorder %s931_s16, %s924_s25 }
  0x28   : > { %p928_p7 = pneg %p927_p6 }
  0x29   : > { %p934_p11 = por %p933_p10, %p932_p3 }
  0x2b   : > { %p935_p13 = pnand %p934_p11, %p928_p7 }
  0x2d   : > { %938 = shalt.err (!%p935_p13)
}
  0x2e   : > { %825 = dma.hbm_to_vmem [thread:$0]  (!%p1212_p0), %s272_s12, 64, %s275_s15, %s262_s14  }
  0x2f   : > { %p1230_p5 = pnand %p780_p1, %p299_p2  ;;  %s292_s25 = scalar_lea.hbm %s1338_s1, %s776_s19 }
  0x30   : > { %s285_s10 = scalar_lea.vmem [#allocation6], %s774_s24  ;;  %s282_s0 = scalar_lea.sflag [#allocation7], %s1197_s22 }
  0x31   : > { %s294_s16 = sshll.u32 %s285_s10, 4  ;;  %s1070_s12 = smov [#allocation6]   ;;  %s295_s16 = int_to_ptr.vmem [resolvable:$true] %s294_s16 }
  0x32   : > { %s952_s9 = scalar_lea.vmem %s295_s16, 64  ;;  %s957_s15 = sshll.u32 %s1070_s12, 4  ;;  %s958_s15 = int_to_ptr.vmem [resolvable:$false] %s957_s15 }
  0x33   : > { %p953_p6 = scmp.ne.s32.totalorder %s295_s16, %s952_s9  ;;  %s959_s14 = scalar_lea.vmem %s958_s15, 128 }
  0x34   : > { %p960_p1 = scmp.lt.s32.totalorder %s295_s16, %s958_s15  ;;  %p961_p2 = scmp.lt.s32.totalorder %s959_s14, %s952_s9 }
  0x35   : > { %p955_p7 = pnand %p953_p6, %p913_p4 }
  0x36   : > { %p962_p10 = por %p961_p2, %p960_p1 }
  0x37   : > { %p956_p3 = pneg %p955_p7 }
  0x39   : > { %p963_p11 = pnand %p962_p10, %p956_p3 }
  0x3b   : > { %966 = shalt.err (!%p963_p11)
}
  0x3c   : > { %828 = dma.hbm_to_vmem [thread:$0]  (!%p1212_p0), %s292_s25, 64, %s295_s16, %s282_s0  }
  0x3d   : > { %303 = sbr.rel (%p1230_p5) target bundleno = 546 (0x222), region = 48  ;;  %s1248_s22 = sand.u32 (!%p1230_p5), 1, %s1043_s27  }
  0x3e   : > { %s1251_s24 = sshll.u32 (!%p1230_p5), %s1248_s22, 2  ;;  %s306_s19 = scalar_lea.sflag (!%p1230_p5), [#allocation4], %s1248_s22 }
  0x3f   : > { %s309_s9 = scalar_lea.vmem (!%p1230_p5), [#allocation3], %s1251_s24 }
  0x42   : > { %1026 = dma.done.wait (%p1181_p8), %s306_s19, 64  }
  0x43   : > { %1028 = vsyncadd (%p1181_p8), %s306_s19, 4294967232  ;;  %s315_s0 = scalar_lea.sflag [#allocation7], %s1248_s22  ;;  %s318_s21 = scalar_lea.vmem [#allocation6], %s1251_s24 }
  0x44   : > { %1030 = dma.done.wait (%p1181_p8), %s315_s0, 64  }
  0x45   : > { %1032 = vsyncadd (%p1181_p8), %s315_s0, 4294967232  ;;  %v1071_v0 = vmov 0.0   ;;  %vm1072_vm0 = vmmov 0   ;;  %v1073_v1 = vmov 1   ;;  %v1074_v2 = vmov 0   ;;  %s358_s15 = sld [smem:[#allocation2]] }
  0x46   : > { %801 = vmatprep.subr.mxu0 %v1071_v0  ;;  %806 = vmatprep.subr.mxu1 %v1071_v0  ;;  %vm369_vm1 = vcmask 1043456   ;;  %vm365_vm2 = vcmask 31744   ;;  %v354_v3 = vld [vmem:[%s309_s9] sm:$0xf]  ;;  %v355_v4 = vld [vmem:[%s318_s21] sm:$0xf] }
  0x47   : > { %803 = vmatprep.mubr.msk.f32.mxu0 %vm1072_vm0, %v1071_v0  ;;  %808 = vmatprep.mubr.msk.f32.mxu1 %vm1072_vm0, %v1071_v0  ;;  %v359_v5 = vld [vmem:[%s1339_s2] sm:$0xf]  ;;  %v357_v8 = vld [vmem:[%s1342_s5 + $0x4] sm:$0xf]  ;;  %v1075_v9 = vmov 2   ;;  %s791_s9 = sshll.u32 %s1055_s30, 1 }
  0x48   : > { %904 = vset.pattern.permute.xlu0 %v1073_v1  ;;  %905 = vset.pattern.permute.xlu1 %v1074_v2  ;;  %v444_v6 = vld [vmem:[%s1340_s3] sm:$0xf]  ;;  %s656_s0 = sadd.s32 %s1051_s29, %s791_s9  ;;  %s353_s11 = scalar_lea.vmem [#allocation8], %s1251_s24 }
  0x49   : > { %802 = vmatpush3.msk.msra.mxu0 %vm369_vm1, %v354_v3  ;;  %807 = vmatpush3.msk.msra.mxu1 %vm369_vm1, %v355_v4  ;;  %v356_v7 = vld [vmem:[%s1342_s5] sm:$0xf]  ;;  %s792_s21 = sshll.u32 %s656_s0, 6  ;;  %s660_s20 = sshll.u32 %s353_s11, 4  ;;  %s661_s20 = int_to_ptr.vmem [resolvable:$true] %s660_s20 }
  0x4a   : > { %804 = vmatmul.mubr.msk.f32.vlgmr.msra.gmra.mxu0 %vm365_vm2, %v359_v5  ;;  %809 = vmatmul.mubr.msk.f32.vlgmr.msra.gmra.mxu1 %vm365_vm2, %v444_v6  ;;  %v561_v46 = vld [vmem:[%s1341_s4] sm:$0xf]  ;;  %s658_s25 = scalar_lea.hbm %s1344_s7, %s792_s21  ;;  %s645_s10 = scalar_lea.sflag [#allocation5], %s1248_s22 }
  0x4b   : > { %362 = vperm.xlu0 %904, %v356_v7   ;;  %528 = vperm.xlu1 %905, %v356_v7   ;;  %v545_v31 = vstv %s358_s15  ;;  %s967_s16 = scalar_lea.vmem %s661_s20, 64  ;;  %s1076_s29 = smov [#allocation8]  }
  0x4c   : > { %811 = vmatprep.subr.mxu0 %v1071_v0  ;;  %813 = vmatprep.mubr.msk.f32.mxu0 %vm1072_vm0, %v1071_v0  ;;  %p968_p8 = scmp.ne.s32.totalorder %s661_s20, %s967_s16  ;;  %s971_s30 = sshll.u32 %s1076_s29, 4  ;;  %s972_s30 = int_to_ptr.vmem [resolvable:$false] %s971_s30 }
  0x4d   : > { %s973_s24 = scalar_lea.vmem %s972_s30, 128  ;;  %p974_p13 = scmp.lt.s32.totalorder %s661_s20, %s972_s30 }
  0x4e   : > { %p969_p0 = pnand %p968_p8, %p1185_p9  ;;  %p975_p5 = scmp.lt.s32.totalorder %s973_s24, %s967_s16 }
  0x4f   : > { %447 = vperm.xlu0 %904, %v357_v8   ;;  %533 = vperm.xlu1 %905, %v357_v8  }
  0x50   : > { %p970_p4 = pneg %p969_p0  ;;  %p976_p6 = por %p975_p5, %p974_p13 }
  0x52   : > { %p977_p7 = pnand %p976_p6, %p970_p4 }
  0x53   : > { %906 = vset.pattern.permute.xlu0 %v1075_v9 }
  0x54   : > { %563 = vperm.xlu0 %906, %v356_v7  }
  0xc6   : > { %v363_v10 = vpop.permute.xlu0 %362  ;;  %v529_v11 = vpop.permute.xlu1 %528 }
  0xca   : > { %v448_v12 = vpop.permute.xlu0 %447  ;;  %v534_v21 = vpop.permute.xlu1 %533 }
  0xcf   : > { %v564_v47 = vpop.permute.xlu0 %563 }
 0x10a   : > { %v439_v13 = vpop.f32.mrf.mxu0  ;;  %v522_v14 = vpop.f32.mrf.mxu1 }
 0x10b   : > { %v440_v15 = vadd.f32 %v439_v13, %v363_v10  ;;  %v523_v16 = vadd.f32 %v522_v14, %v448_v12 }
 0x10c   : > { %v805_v17 = vpop.f32.mrf.mxu0  ;;  %v810_v18 = vpop.f32.mrf.mxu1 }
 0x10d   : > { %v443_v19 = vmax.f32 %v440_v15, 0.0  ;;  %v526_v20 = vmax.f32 %v523_v16, 0.0 }
 0x10f   : > { %v531_v22 = vmul.f32 %v529_v11, %v443_v19  ;;  %v536_v23 = vmul.f32 %v534_v21, %v526_v20 }
 0x111   : > { %v537_v24 = vadd.f32 %v536_v23, %v531_v22 }
 0x113   : > { %v538_v25 = vsel %vm369_vm1, %v537_v24, 0.0 }
 0x114   : > { %v539_v26 = vrot.slane %v538_v25, 4 }
 0x116   : > { %v540_v27 = vadd.f32 %v539_v26, %v538_v25 }
 0x118   : > { %v541_v28 = vrot.slane %v540_v27, 2 }
 0x11a   : > { %v542_v29 = vadd.f32 %v541_v28, %v540_v27 }
 0x11c   : > { %v543_v30 = vrot.slane %v542_v29, 1 }
 0x11e   : > { %v544_v32 = vadd.f32 %v543_v30, %v542_v29 }
 0x120   : > { %v546_v33 = vadd.f32 %v545_v31, %v544_v32 }
 0x122   : > { %v547_v34 = vand.u32 2147483647, %v546_v33  ;;  %vm554_vm3 = vcmp.ge.f32.partialorder %v546_v33, 0.0 }
 0x124   : > { %v548_v35 = vsub.f32 0.0, %v547_v34 }
 0x126   : > { %v549_v36 = vmul.f32 1.442695, %v548_v35 }
 0x128   : > { %907 = vpow2.f32 %v549_v36 }
 0x135   : > { %v908_v37 = vpop.eup %907 }
 0x136   : > { %v551_v38 = vadd.f32 1.0, %v908_v37 }
 0x138   : > { %909 = vrcp.f32 %v551_v38 }
 0x145   : > { %v910_v39 = vpop.eup %909 }
 0x146   : > { %v555_v40 = vmul.f32 %v910_v39, %v908_v37 }
 0x148   : > { %v556_v41 = vsel %vm554_vm3, %v910_v39, %v555_v40 }
 0x149   : > { %v557_v42 = vsub.f32 1.0, %v556_v41  ;;  %v558_v43 = vmul.f32 %v556_v41, %v354_v3 }
 0x14b   : > { %v559_v44 = vmul.f32 %v557_v42, %v355_v4 }
 0x14d   : > { %v560_v45 = vadd.f32 %v559_v44, %v558_v43 }
 0x14f   : > { %812 = vmatpush3.msk.msra.mxu0 %vm369_vm1, %v560_v45 }
 0x150   : > { %814 = vmatmul.mubr.msk.f32.vlgmr.msra.gmra.mxu0 %vm365_vm2, %v561_v46 }
 0x210   : > { %v638_v48 = vpop.f32.mrf.mxu0 }
 0x211   : > { %v639_v49 = vadd.f32 %v638_v48, %v564_v47 }
 0x212   : > { %v815_v50 = vpop.f32.mrf.mxu0 }
 0x213   : > { %v642_v51 = vmax.f32 %v639_v49, 0.0 }
 0x215   : > { %643 = vst [vmem:[%s353_s11] sm:$0xf] %v642_v51 }
 0x216   : > { %980 = shalt.err (!%p977_p7)
}
 0x217   : > { %s981_s12 = scalar_lea.hbm %s658_s25, 64  ;;  %s985_s14 = scalar_lea.hbm %s1344_s7, 256 }
 0x218   : > { %p982_p3 = scmp.ne.s32.totalorder %s658_s25, %s981_s12  ;;  %p986_p10 = scmp.lt.s32.totalorder %s658_s25, %s1344_s7 }
 0x219   : > { %p987_p11 = scmp.lt.s32.totalorder %s985_s14, %s981_s12 }
 0x21a   : > { %p983_p1 = pnand %p982_p3, %p1185_p9 }
 0x21b   : > { %p988_p8 = por %p987_p11, %p986_p10 }
 0x21c   : > { %p984_p2 = pneg %p983_p1 }
 0x21e   : > { %p989_p0 = pnand %p988_p8, %p984_p2 }
 0x220   : > { %992 = shalt.err (!%p989_p0)
}
 0x221   : > { %820 = dma.vmem_to_hbm [thread:$0]  (%p1185_p9), %s661_s20, 64, %s658_s25, %s645_s10  }
 0x222 PF: > { %p834_p4 = scmp.ge.s32.totalorder %s1067_s6, 2  ;;  %s672_s21 = sand.u32 1, %s1039_s26  }
 0x223   : > { %s673_s11 = scalar_lea.sflag [#allocation5], %s672_s21 }
 0x224   : > { %p830_p13 = pnand %p834_p4, %p1191_p12 }
 0x226   : > { %p831_p5 = pneg %p830_p13 }
 0x228   : > { %1034 = dma.done.wait (%p831_p5), %s673_s11, 64  }
 0x229   : > { %1036 = vsyncadd (%p831_p5), %s673_s11, 4294967232  ;;  %s27_s6 = sadd.s32 1, %s1067_s6   ;;  %s1362_s30 = sld [smem:[#allocation12_spill]] }
 0x22a   : > { %p24_p6 = scmp.ge.s32.totalorder %s27_s6, 6   ;;  %s1363_s18 = sld [smem:[#allocation13_spill]] }
 0x22b   : > { %s1364_s9 = sld [smem:[#allocation14_spill]]  ;;  %s1365_s26 = smov %s1043_s27 }
 0x22c   : > { %s1366_s27 = smov %s1047_s28  ;;  %s1367_s28 = smov %s1200_s23 }
 0x22d   : > { %s1368_s29 = smov %s1059_s8  ;;  %26 = sbr.rel (!%p24_p6) target bundleno = 12 (0xc), region = 106 }
 0x230   : > { %s1369_s8 = smov %s1363_s18 }
 0x232   :  { %678 = vsyncpa [#allocation4], 1 }
 0x233   :  { %680 = vsyncpa [#allocation4 + $0x1], 1 }
 0x234   :  { %681 = vsyncpa [#allocation7], 1 }
 0x235   :  { %683 = vsyncpa [#allocation7 + $0x1], 1 }
 0x236   :  { %684 = vsyncpa [#allocation5], 1 }
 0x237   :  { %686 = vsyncpa [#allocation5 + $0x1], 1 }

</bundles_post_ra>
